<compile_context>
chip_gen: v7x
topology: tpu7x:2x2x1
jax: 0.10.0
libtpu: 0.0.40
codegen_flags: <defaults>
</compile_context>

<pallas_src>
import functools

import jax
import jax.numpy as jnp
from jax.experimental import pallas as pl
from jax.experimental.pallas import tpu as pltpu

LANE = 128  # lane-dense compute width for the fc3 / softmax slab


def _round_up(x, m):
    return (x + m - 1) // m * m


def brain_forward_kernel(x_ref, w1_ref, b1_ref, w2_ref, b2_ref, w3_ref, b3_ref,
                         out_ref, *, acts_dtype):
    x = x_ref[...]                                   # (tb, 3) f32

    # fc1 + sigmoid. K=3 would waste the MXU contraction dim and add an MXU
    # push/pop on the serial chain; do it as 3 VPU broadcast FMAs.
    w1 = w1_ref[...]                                 # (3, 64)
    z1 = (x[:, 0:1] * w1[0:1, :]
          + x[:, 1:2] * w1[1:2, :]
          + x[:, 2:3] * w1[2:3, :]
          + b1_ref[...])                             # (tb, 64) f32
    h1 = jax.nn.sigmoid(z1.astype(acts_dtype))       # EUP; bf16 on v6e/v7x

    # fc2 + sigmoid (MXU, f32 accumulate).
    z2 = jnp.dot(h1, w2_ref[...], preferred_element_type=jnp.float32)
    h2 = jax.nn.sigmoid((z2 + b2_ref[...]).astype(acts_dtype))   # (tb, 32)

    # fc3 + softmax(dim=-1), computed in a lane-dense LANE-wide slab. Padded
    # columns have zero weights and a -1e30 f32 bias, so exp underflows to 0
    # and the softmax over the real A columns is unchanged. Softmax math stays
    # f32 regardless of acts_dtype.
    logits = jnp.dot(h2, w3_ref[...], preferred_element_type=jnp.float32)
    logits = logits + b3_ref[...]                    # (tb, LANE) f32
    m = jnp.max(logits, axis=-1, keepdims=True)
    e = jnp.exp(logits - m)
    denom = jnp.sum(e, axis=-1, keepdims=True)
    # Exact reciprocal: denom is only (tb, 1), so approx=False is essentially
    # free and keeps the row sums equal to 1 to f32 rounding.
    inv = pl.reciprocal(denom, approx=False)

    # Store only the real A columns (out_ref is (tb, A)): cuts the HBM write
    # from 512 B/row (128-wide f32 slab) to 4*A B/row.
    a = out_ref.shape[-1]
    out_ref[...] = e[:, :a] * inv


def brain_forward(states, params, *, tile_b=4096, acts_dtype=jnp.float32):
    """Forward pass of Brain: softmax(fc3(sigmoid(fc2(sigmoid(fc1(x)))))).

    acts_dtype: jnp.float32 (default, always correct; required on v5e where
      the VPU/EUP have no bf16) or jnp.bfloat16 (recommended on v6e/v7x:
      doubles MXU/VPU/EUP element throughput for the fc2/fc3 + sigmoid path).
    """
    w1, b1, w2, b2, w3, b3 = params
    B, F = states.shape
    A = w3.shape[1]
    assert F == w1.shape[0]
    assert A <= LANE, f"number_actions={A} must be <= {LANE}"

    # Lane-dense fc3 slab: pad to one full vreg (LANE) of output columns.
    w3p = jnp.zeros((w3.shape[0], LANE), jnp.float32).at[:, :A].set(w3)
    b3p = jnp.full((1, LANE), -1e30, jnp.float32).at[:, :A].set(b3)  # stays f32

    # MXU weights follow the activation dtype; biases / fc1 weights stay f32.
    w2c = w2.astype(acts_dtype)
    w3c = w3p.astype(acts_dtype)

    # Batch tile: large (amortizes the ~0.35 us/step grid overhead), a multiple
    # of 8 sublanes, clamped so the grid keeps >= 2 steps whenever there is
    # enough work (both v7x TensorCores get a share and the pipeline overlaps).
    # No explicit batch padding: the ragged edge block is clipped on writeback.
    tb = _round_up(min(tile_b, B), 8)
    while tb > 8 and pl.cdiv(B, tb) < 2:
        tb = _round_up(tb // 2, 8)
    grid = (pl.cdiv(B, tb),)

    def const_spec(a):
        # Weight-resident block: constant index -> DMAed once, stays in VMEM.
        return pl.BlockSpec(a.shape, lambda i: (0,) * a.ndim)

    cost = pl.CostEstimate(
        flops=int(2 * B * (F * 64 + 64 * 32 + 32 * A)),
        transcendentals=int(B * (64 + 32 + A)),
        bytes_accessed=int(B * (F + A) * 4
                           + 4 * (w1.size + b1.size + w2.size + b2.size)
                           + w3c.size * w3c.dtype.itemsize + b3p.size * 4),
    )

    kernel = functools.partial(brain_forward_kernel, acts_dtype=acts_dtype)

    # TODO(synk): the (tb, 3) input block writes only 12 B per 512 B VMEM row,
    # so the input DMA is sublane-granule bound; if xprof shows it exposed at
    # large tile_b, pass states pre-transposed as (3, B) with a lane-dense
    # (3, tb) block instead.
    return pl.pallas_call(
        kernel,
        out_shape=jax.ShapeDtypeStruct((B, A), jnp.float32),
        grid=grid,
        in_specs=[pl.BlockSpec((tb, F), lambda i: (i, 0)),
                  const_spec(w1), const_spec(b1),
                  const_spec(w2c), const_spec(b2),
                  const_spec(w3c), const_spec(b3p)],
        out_specs=pl.BlockSpec((tb, A), lambda i: (i, 0)),
        compiler_params=pltpu.CompilerParams(
            dimension_semantics=("parallel",),
            vmem_limit_bytes=40 * 1024 * 1024),
        cost_estimate=cost,
    )(states, w1, b1, w2c, b2, w3c, b3p)


def init_params(key, number_actions):
    # Deterministic synthetic init (PyTorch default-ish uniform scale).
    def linear(key, fan_in, fan_out):
        k_w, k_b = jax.random.split(key)
        bound = 1.0 / jnp.sqrt(fan_in)
        w = jax.random.uniform(k_w, (fan_in, fan_out), jnp.float32, -bound, bound)
        b = jax.random.uniform(k_b, (1, fan_out), jnp.float32, -bound, bound)
        return w, b

    k1, k2, k3 = jax.random.split(key, 3)
    w1, b1 = linear(k1, 3, 64)
    w2, b2 = linear(k2, 64, 32)
    w3, b3 = linear(k3, 32, number_actions)
    return (w1, b1, w2, b2, w3, b3)


def _reference(states, params):
    w1, b1, w2, b2, w3, b3 = params
    h1 = jax.nn.sigmoid(states @ w1 + b1)
    h2 = jax.nn.sigmoid(h1 @ w2 + b2)
    return jax.nn.softmax(h2 @ w3 + b3, axis=-1)


if __name__ == "__main__":
    key = jax.random.PRNGKey(0)
    k_params, k_states = jax.random.split(key)

    number_actions = 4
    batch = 16
    params = init_params(k_params, number_actions)
    states = jax.random.normal(k_states, (batch, 3), jnp.float32)
    ref = _reference(states, params)

    # 1) Small tile so the demo batch exercises a multi-step grid
    #    (production default is tile_b=4096).
    q_values = brain_forward(states, params, tile_b=8)
    q_values = jax.block_until_ready(q_values)
    assert q_values.shape == (batch, number_actions)
    assert jnp.allclose(q_values, ref, atol=1e-3, rtol=1e-3), "mismatch vs reference"
    assert jnp.allclose(jnp.sum(q_values, axis=-1), 1.0, atol=1e-3)

    # 2) Ragged batch with the default tile selection (no padding copy; the
    #    edge block writeback is clipped, grid is clamped to >= 2 steps).
    states_r = jax.random.normal(jax.random.PRNGKey(1), (13, 3), jnp.float32)
    ref_r = _reference(states_r, params)
    q_r = jax.block_until_ready(brain_forward(states_r, params))
    assert q_r.shape == (13, number_actions)
    assert jnp.allclose(q_r, ref_r, atol=1e-3, rtol=1e-3), "ragged mismatch"
    assert jnp.allclose(jnp.sum(q_r, axis=-1), 1.0, atol=1e-3)

    # 3) bf16-activation path (the v6e/v7x recommendation); softmax stays f32
    #    so rows still sum to 1 tightly, elements agree to bf16 precision.
    q_bf16 = jax.block_until_ready(
        brain_forward(states, params, tile_b=8, acts_dtype=jnp.bfloat16))
    assert jnp.allclose(q_bf16, ref, atol=1e-2, rtol=1e-2), "bf16 mismatch"
    assert jnp.allclose(jnp.sum(q_bf16, axis=-1), 1.0, atol=1e-3)

    print("KERNEL_OK")
</pallas_src>

<mosaic_0001>
module attributes {stable_mosaic.version = 11 : i64} {
  func.func @brain_forward_kernel(%arg0: i32, %arg1: memref<8x3xf32, #tpu.memory_space<vmem>>, %arg2: memref<3x64xf32, #tpu.memory_space<vmem>>, %arg3: memref<1x64xf32, #tpu.memory_space<vmem>>, %arg4: memref<64x32xf32, #tpu.memory_space<vmem>>, %arg5: memref<1x32xf32, #tpu.memory_space<vmem>>, %arg6: memref<32x128xf32, #tpu.memory_space<vmem>>, %arg7: memref<1x128xf32, #tpu.memory_space<vmem>>, %arg8: memref<8x4xf32, #tpu.memory_space<vmem>>) attributes {dimension_semantics = [#tpu.dimension_semantics<parallel>], iteration_bounds = array<i64: 2>, scalar_prefetch = 0 : i64, scratch_operands = 0 : i64, tpu.core_type = #tpu.core_type<tc>, window_params = [{transform_indices = @transform_0, window_bounds = array<i64: 8, 3>}, {pipeline_mode = #tpu.pipeline_mode<synchronous>, transform_indices = @transform_1, window_bounds = array<i64: 3, 64>}, {pipeline_mode = #tpu.pipeline_mode<synchronous>, transform_indices = @transform_2, window_bounds = array<i64: 1, 64>}, {pipeline_mode = #tpu.pipeline_mode<synchronous>, transform_indices = @transform_3, window_bounds = array<i64: 64, 32>}, {pipeline_mode = #tpu.pipeline_mode<synchronous>, transform_indices = @transform_4, window_bounds = array<i64: 1, 32>}, {pipeline_mode = #tpu.pipeline_mode<synchronous>, transform_indices = @transform_5, window_bounds = array<i64: 32, 128>}, {pipeline_mode = #tpu.pipeline_mode<synchronous>, transform_indices = @transform_6, window_bounds = array<i64: 1, 128>}, {transform_indices = @transform_7, window_bounds = array<i64: 8, 4>}]} {
    %c0 = arith.constant 0 : index
    %c0_0 = arith.constant 0 : index
    %0 = vector.load %arg1[%c0, %c0_0] : memref<8x3xf32, #tpu.memory_space<vmem>>, vector<8x3xf32>
    %c0_1 = arith.constant 0 : index
    %c0_2 = arith.constant 0 : index
    %1 = vector.load %arg2[%c0_1, %c0_2] : memref<3x64xf32, #tpu.memory_space<vmem>>, vector<3x64xf32>
    %2 = vector.extract_strided_slice %0 {offsets = [0, 0], sizes = [8, 1], strides = [1, 1]} : vector<8x3xf32> to vector<8x1xf32>
    %3 = vector.extract_strided_slice %1 {offsets = [0, 0], sizes = [1, 64], strides = [1, 1]} : vector<3x64xf32> to vector<1x64xf32>
    %4 = vector.broadcast %2 : vector<8x1xf32> to vector<8x64xf32>
    %5 = vector.broadcast %3 : vector<1x64xf32> to vector<8x64xf32>
    %6 = arith.mulf %4, %5 : vector<8x64xf32>
    %7 = vector.extract_strided_slice %0 {offsets = [0, 1], sizes = [8, 1], strides = [1, 1]} : vector<8x3xf32> to vector<8x1xf32>
    %8 = vector.extract_strided_slice %1 {offsets = [1, 0], sizes = [1, 64], strides = [1, 1]} : vector<3x64xf32> to vector<1x64xf32>
    %9 = vector.broadcast %7 : vector<8x1xf32> to vector<8x64xf32>
    %10 = vector.broadcast %8 : vector<1x64xf32> to vector<8x64xf32>
    %11 = arith.mulf %9, %10 : vector<8x64xf32>
    %12 = arith.addf %6, %11 : vector<8x64xf32>
    %13 = vector.extract_strided_slice %0 {offsets = [0, 2], sizes = [8, 1], strides = [1, 1]} : vector<8x3xf32> to vector<8x1xf32>
    %14 = vector.extract_strided_slice %1 {offsets = [2, 0], sizes = [1, 64], strides = [1, 1]} : vector<3x64xf32> to vector<1x64xf32>
    %15 = vector.broadcast %13 : vector<8x1xf32> to vector<8x64xf32>
    %16 = vector.broadcast %14 : vector<1x64xf32> to vector<8x64xf32>
    %17 = arith.mulf %15, %16 : vector<8x64xf32>
    %18 = arith.addf %12, %17 : vector<8x64xf32>
    %c0_3 = arith.constant 0 : index
    %c0_4 = arith.constant 0 : index
    %19 = vector.load %arg3[%c0_3, %c0_4] : memref<1x64xf32, #tpu.memory_space<vmem>>, vector<1x64xf32>
    %20 = vector.broadcast %19 : vector<1x64xf32> to vector<8x64xf32>
    %21 = arith.addf %18, %20 : vector<8x64xf32>
    %22 = arith.negf %21 : vector<8x64xf32>
    %23 = math.exp %22 : vector<8x64xf32>
    %cst = arith.constant 1.000000e+00 : f32
    %24 = vector.broadcast %cst : f32 to vector<8x64xf32>
    %25 = arith.addf %24, %23 : vector<8x64xf32>
    %26 = arith.divf %24, %25 : vector<8x64xf32>
    %c0_5 = arith.constant 0 : index
    %c0_6 = arith.constant 0 : index
    %27 = vector.load %arg4[%c0_5, %c0_6] : memref<64x32xf32, #tpu.memory_space<vmem>>, vector<64x32xf32>
    %cst_7 = arith.constant dense<0.000000e+00> : vector<8x32xf32>
    %28 = tpu.matmul %26, %27, %cst_7 {dimension_numbers = #tpu.dot_dimension_numbers<[1], [0], [0], [1], [0, 0, 1, 1], [], []>} : vector<8x64xf32>, vector<64x32xf32>, vector<8x32xf32> -> vector<8x32xf32>
    %c0_8 = arith.constant 0 : index
    %c0_9 = arith.constant 0 : index
    %29 = vector.load %arg5[%c0_8, %c0_9] : memref<1x32xf32, #tpu.memory_space<vmem>>, vector<1x32xf32>
    %30 = vector.broadcast %29 : vector<1x32xf32> to vector<8x32xf32>
    %31 = arith.addf %28, %30 : vector<8x32xf32>
    %32 = arith.negf %31 : vector<8x32xf32>
    %33 = math.exp %32 : vector<8x32xf32>
    %cst_10 = arith.constant 1.000000e+00 : f32
    %34 = vector.broadcast %cst_10 : f32 to vector<8x32xf32>
    %35 = arith.addf %34, %33 : vector<8x32xf32>
    %36 = arith.divf %34, %35 : vector<8x32xf32>
    %c0_11 = arith.constant 0 : index
    %c0_12 = arith.constant 0 : index
    %37 = vector.load %arg6[%c0_11, %c0_12] : memref<32x128xf32, #tpu.memory_space<vmem>>, vector<32x128xf32>
    %cst_13 = arith.constant dense<0.000000e+00> : vector<8x128xf32>
    %38 = tpu.matmul %36, %37, %cst_13 {dimension_numbers = #tpu.dot_dimension_numbers<[1], [0], [0], [1], [0, 0, 1, 1], [], []>} : vector<8x32xf32>, vector<32x128xf32>, vector<8x128xf32> -> vector<8x128xf32>
    %c0_14 = arith.constant 0 : index
    %c0_15 = arith.constant 0 : index
    %39 = vector.load %arg7[%c0_14, %c0_15] : memref<1x128xf32, #tpu.memory_space<vmem>>, vector<1x128xf32>
    %40 = vector.broadcast %39 : vector<1x128xf32> to vector<8x128xf32>
    %41 = arith.addf %38, %40 : vector<8x128xf32>
    %cst_16 = arith.constant dense<0xFF800000> : vector<8xf32>
    %42 = vector.multi_reduction <maximumf>, %41, %cst_16 [1] : vector<8x128xf32> to vector<8xf32>
    %43 = vector.shape_cast %42 : vector<8xf32> to vector<8x1xf32>
    %44 = vector.broadcast %43 : vector<8x1xf32> to vector<8x128xf32>
    %45 = arith.subf %41, %44 : vector<8x128xf32>
    %46 = math.exp %45 : vector<8x128xf32>
    %cst_17 = arith.constant dense<0.000000e+00> : vector<8xf32>
    %47 = vector.multi_reduction <add>, %46, %cst_17 [1] : vector<8x128xf32> to vector<8xf32>
    %48 = vector.shape_cast %47 : vector<8xf32> to vector<8x1xf32>
    %49 = tpu.reciprocal %48 : vector<8x1xf32> -> vector<8x1xf32>
    %50 = vector.extract_strided_slice %46 {offsets = [0, 0], sizes = [8, 4], strides = [1, 1]} : vector<8x128xf32> to vector<8x4xf32>
    %51 = vector.broadcast %49 : vector<8x1xf32> to vector<8x4xf32>
    %52 = arith.mulf %50, %51 : vector<8x4xf32>
    %c0_18 = arith.constant 0 : index
    %c0_19 = arith.constant 0 : index
    %53 = vector.load %arg8[%c0_18, %c0_19] : memref<8x4xf32, #tpu.memory_space<vmem>>, vector<8x4xf32>
    tpu.vector_store %arg8[%c0_18, %c0_19], %52 {strides = array<i32>} : memref<8x4xf32, #tpu.memory_space<vmem>>, vector<8x4xf32>,
    return
  }
  func.func @transform_0(%arg0: i32) -> (i32, i32) {
    %c0_i32 = arith.constant 0 : i32
    %c0_i32_0 = arith.constant 0 : i32
    return %arg0, %c0_i32 : i32, i32
  }
  func.func @transform_1(%arg0: i32) -> (i32, i32) {
    %c0_i32 = arith.constant 0 : i32
    %c0_i32_0 = arith.constant 0 : i32
    %c0_i32_1 = arith.constant 0 : i32
    return %c0_i32, %c0_i32_0 : i32, i32
  }
  func.func @transform_2(%arg0: i32) -> (i32, i32) {
    %c0_i32 = arith.constant 0 : i32
    %c0_i32_0 = arith.constant 0 : i32
    %c0_i32_1 = arith.constant 0 : i32
    return %c0_i32, %c0_i32_0 : i32, i32
  }
  func.func @transform_3(%arg0: i32) -> (i32, i32) {
    %c0_i32 = arith.constant 0 : i32
    %c0_i32_0 = arith.constant 0 : i32
    %c0_i32_1 = arith.constant 0 : i32
    return %c0_i32, %c0_i32_0 : i32, i32
  }
  func.func @transform_4(%arg0: i32) -> (i32, i32) {
    %c0_i32 = arith.constant 0 : i32
    %c0_i32_0 = arith.constant 0 : i32
    %c0_i32_1 = arith.constant 0 : i32
    return %c0_i32, %c0_i32_0 : i32, i32
  }
  func.func @transform_5(%arg0: i32) -> (i32, i32) {
    %c0_i32 = arith.constant 0 : i32
    %c0_i32_0 = arith.constant 0 : i32
    %c0_i32_1 = arith.constant 0 : i32
    return %c0_i32, %c0_i32_0 : i32, i32
  }
  func.func @transform_6(%arg0: i32) -> (i32, i32) {
    %c0_i32 = arith.constant 0 : i32
    %c0_i32_0 = arith.constant 0 : i32
    %c0_i32_1 = arith.constant 0 : i32
    return %c0_i32, %c0_i32_0 : i32, i32
  }
  func.func @transform_7(%arg0: i32) -> (i32, i32) {
    %c0_i32 = arith.constant 0 : i32
    %c0_i32_0 = arith.constant 0 : i32
    return %arg0, %c0_i32 : i32, i32
  }
}

</mosaic_0001>

<bundles_post_ra>
// kernel: tpu_custom_call.1
= control target key start
LH: loop header
LB: loop body
LE: loop exit
PB: predicated region body
PF: predicated region fallthrough
CT: control target
= control target key end

     0   :  { %s726_s24 = smov 0   ;;  %s798_s0 = inlined_call_operand.vmem [shape: f32[16,3], index: 0, kind: input, shape index: {}]   ;;  %s799_s1 = inlined_call_operand.vmem [shape: f32[3,64], index: 1, kind: input, shape index: {}]   ;;  %s800_s2 = inlined_call_operand.vmem [shape: f32[1,64], index: 2, kind: input, shape index: {}]   ;;  %s801_s3 = inlined_call_operand.vmem [shape: f32[64,32], index: 3, kind: input, shape index: {}]   ;;  %s802_s4 = inlined_call_operand.vmem [shape: f32[1,32], index: 4, kind: input, shape index: {}]   ;;  %s803_s5 = inlined_call_operand.vmem [shape: f32[32,128], index: 5, kind: input, shape index: {}]   ;;  %s804_s6 = inlined_call_operand.vmem [shape: f32[1,128], index: 6, kind: input, shape index: {}]   ;;  %s805_s7 = inlined_call_operand.vmem [shape: f32[16,4], index: 7, kind: output, shape index: {}]  }
   0x1 LB: > { %s564_s25 = sadd.s32 4294967295, %s678_s24   ;;  %p568_p0 = scmp.ge.s32.totalorder %s678_s24, 1  ;;  %s678_s24 = sphi %s726_s24, %s17_s24  }
   0x2   : > { %p236_p1 = scmp.lt.s32.totalorder %s678_s24, 3 }
   0x4   : > { %p237_p2 = pnand %p568_p0, %p236_p1 }
   0x5   : > { %p266_p3 = scmp.lt.s32.totalorder (!%p237_p2), %s564_s25, 1  ;;  %v680_v0 = vmov (!%p237_p2), 0   ;;  %v681_v1 = vmov (!%p237_p2), 2   ;;  %v682_v3 = vmov (!%p237_p2), 1   ;;  %v320_v4 = vld [vmem:[%s801_s3] sm:$0xff] (!%p237_p2)  ;;  %v321_v5 = vld [vmem:[%s801_s3 + $0x8] sm:$0xff] (!%p237_p2)  ;;  %v281_v18 = vlaneseq (!%p237_p2) }
   0x6   : > { %240 = sbr.rel (%p237_p2) target bundleno = 951 (0x3b7), region = 48  ;;  %656 = vset.pattern.permute.xlu0 (!%p237_p2), %v680_v0  ;;  %658 = vset.pattern.permute.xlu1 (!%p237_p2), %v681_v1  ;;  %v625_v6 = vpack.c.bf16 (!%p237_p2), %v321_v5, %v320_v4  ;;  %v683_v7 = vmov (!%p237_p2), 0.0|0.0   ;;  %v322_v8 = vld [vmem:[%s801_s3 + $0x10] sm:$0xff] (!%p237_p2)  ;;  %v323_v9 = vld [vmem:[%s801_s3 + $0x18] sm:$0xff] (!%p237_p2)  ;;  %v324_v11 = vld [vmem:[%s801_s3 + $0x20] sm:$0xff] (!%p237_p2)  ;;  %vm684_vm0 = vmmov (!%p237_p2), 0  }
   0x7   : > { %624 = vmatprep.subr.bf16.mxu0 (!%p237_p2), %v683_v7  ;;  %636 = vmatprep.subr.bf16.mxu1 (!%p237_p2), %v683_v7  ;;  %v628_v10 = vpack.c.bf16 (!%p237_p2), %v323_v9, %v322_v8  ;;  %v325_v12 = vld [vmem:[%s801_s3 + $0x28] sm:$0xff] (!%p237_p2)  ;;  %v326_v14 = vld [vmem:[%s801_s3 + $0x30] sm:$0xff] (!%p237_p2)  ;;  %v327_v15 = vld [vmem:[%s801_s3 + $0x38] sm:$0xff] (!%p237_p2)  ;;  %v685_v16 = vmov (!%p237_p2), 0.0   ;;  %v282_v19 = vshrl.u32 (!%p237_p2), %v281_v18, 7  ;;  %vm335_vm1 = vcmask (!%p237_p2), 523264  }
   0x8   : > { %626 = vmatpush3.bf16.msra.mxu0 (!%p237_p2), %v625_v6  ;;  %v631_v13 = vpack.c.bf16 (!%p237_p2), %v325_v12, %v324_v11  ;;  %610 = vmatprep.mubr.msk.f32.mxu0 (!%p237_p2), %vm684_vm0, %v685_v16  ;;  %v634_v17 = vpack.c.bf16 (!%p237_p2), %v327_v15, %v326_v14  ;;  %v275_v23 = vld [vmem:[%s799_s1] sm:$0x7] (!%p237_p2)  ;;  %v416_v42 = vld [vmem:[%s803_s5 + $0x8] sm:$0xff] (!%p237_p2)  ;;  %v417_v43 = vld [vmem:[%s803_s5 + $0x10] sm:$0xff] (!%p237_p2)  ;;  %vm426_vm2 = vcmask (!%p237_p2), 261120   ;;  %vm509_vm3 = vcmask (!%p237_p2), 31744  }
   0x9   : > { %627 = vmatprep.subr.bf16.mxu0 (!%p237_p2), %v683_v7  ;;  %621 = vmatprep.mubr.msk.f32.mxu1 (!%p237_p2), %vm684_vm0, %v685_v16  ;;  %v283_v20 = vsub.s32 (!%p237_p2), 0, %v282_v19  ;;  %v292_v21 = vsub.s32 (!%p237_p2), 1, %v282_v19  ;;  %v302_v22 = vsub.s32 (!%p237_p2), 2, %v282_v19  ;;  %v571_v34 = vld [vmem:[%s800_s2] ss:$0 sm:$0xff] (!%p237_p2)  ;;  %v418_v45 = vld [vmem:[%s803_s5 + $0x18] sm:$0xff] (!%p237_p2) }
   0xa   : > { %v415_v41 = vld [vmem:[%s803_s5] sm:$0xff] (!%p237_p2)  ;;  %v640_v46 = vpack.c.bf16 (!%p237_p2), %v418_v45, %v417_v43 }
   0xb   : > { %v284_v25 = vrot.slane (!%p237_p2), %v275_v23, %v283_v20  ;;  %v293_v26 = vrot.slane (!%p237_p2), %v275_v23, %v292_v21  ;;  %v303_v27 = vrot.slane (!%p237_p2), %v275_v23, %v302_v22  ;;  %v637_v44 = vpack.c.bf16 (!%p237_p2), %v416_v42, %v415_v41  ;;  %v573_v47 = vld [vmem:[%s802_s4] ss:$0 sm:$0xff] (!%p237_p2) }
   0xc   : > { %629 = vmatpush3.bf16.msra.mxu0 (!%p237_p2), %v628_v10  ;;  %v576_v55 = vld [vmem:[%s804_s6] ss:$0 sm:$0xff] (!%p237_p2) }
   0xd   : > { %s807_s25 = smov (!%p266_p3, %s564_s25), 1  ;;  %630 = vmatprep.subr.bf16.mxu0 %v683_v7  ;;  %638 = vmatpush3.bf16.msra.mxu1 %v637_v44 }
   0xe   : > { %s569_s26 = sshll.u32 %s807_s25, 3  ;;  %639 = vmatprep.subr.bf16.mxu1 %v683_v7 }
   0xf   : > { %s269_s29 = scalar_lea.vmem %s798_s0, %s569_s26  ;;  %s273_s21 = scalar_lea.vmem %s805_s7, %s569_s26 }
  0x10   : > { %v274_v2 = vld [vmem:[%s269_s29] sm:$0xff]  ;;  %632 = vmatpush3.bf16.msra.mxu0 %v631_v13 }
  0x11   : > { %278 = vperm.xlu0 %656, %v274_v2   ;;  %297 = vperm.xlu1 %658, %v274_v2  }
  0x12   : > { %633 = vmatprep.subr.bf16.mxu0 %v683_v7  ;;  %641 = vmatpush3.bf16.msra.mxu1 %v640_v46 }
  0x14   : > { %635 = vmatpush3.bf16.msra.mxu0 %v634_v17 }
  0x15   : > { %657 = vset.pattern.permute.xlu0 %v682_v3 }
  0x16   : > { %287 = vperm.xlu0 %657, %v274_v2  }
  0x1a   : > { %659 = vset.pattern.permute.xlu0 %v681_v1 }
  0x90   : > { %v279_v24 = vpop.permute.xlu0 %278  ;;  %v298_v28 = vpop.permute.xlu1 %297 }
  0x91   : > { %v285_v30 = vmul.f32 %v284_v25, %v279_v24  ;;  %v304_v32 = vmul.f32 %v303_v27, %v298_v28 }
  0x95   : > { %v288_v29 = vpop.permute.xlu0 %287 }
  0x96   : > { %v294_v31 = vmul.f32 %v293_v26, %v288_v29 }
  0x98   : > { %v295_v33 = vadd.f32 %v294_v31, %v285_v30 }
  0x9a   : > { %v305_v35 = vadd.f32 %v304_v32, %v295_v33 }
  0x9c   : > { %v313_v36 = vadd.f32 %v571_v34, %v305_v35 }
  0x9e   : > { %v572_v37 = vmul.f32 -1.442695, %v313_v36 }
  0xa0   : > { %660 = vpow2.f32 %v572_v37 }
  0xaa   : > { %v661_v38 = vpop.eup %660 }
  0xab   : > { %v317_v39 = vadd.f32 1.0, %v661_v38 }
  0xad   : > { %662 = vrcp.f32 %v317_v39 }
  0xb7   : > { %v663_v40 = vpop.eup %662 }
  0xb8   : > { %611 = vmatmul.mubr.msk.f32.vlgmr.msra.gmra.mrb[0].mxu0 %vm335_vm1, %v663_v40 }
 0x18b   : > { %v405_v48 = vpop.f32.mrb[0].mxu0 }
 0x18c   : > { %v406_v49 = vadd.f32 %v573_v47, %v405_v48  ;;  %v612_v50 = vpop.f32.mrb[1].mxu0 }
 0x18e   : > { %v575_v51 = vmul.f32 -1.442695, %v406_v49 }
 0x190   : > { %664 = vpow2.f32 %v575_v51 }
 0x19a   : > { %v665_v52 = vpop.eup %664 }
 0x19b   : > { %v412_v53 = vadd.f32 1.0, %v665_v52 }
 0x19d   : > { %666 = vrcp.f32 %v412_v53 }
 0x1a7   : > { %v667_v54 = vpop.eup %666 }
 0x1a8   : > { %622 = vmatmul.mubr.msk.f32.vlgmr.msra.gmra.mrb[0].mxu1 %vm426_vm2, %v667_v54 }
 0x27b   : > { %v496_v56 = vpop.f32.mrb[0].mxu1 }
 0x27c   : > { %v497_v57 = vadd.f32 %v576_v55, %v496_v56  ;;  %v623_v58 = vpop.f32.mrb[1].mxu1 }
 0x27e   : > { %500 = vmax.xlane.f32.xlu1 %v497_v57 }
 0x30b   : > { %v501_v59 = vpop.xlane.xlu1 %500 }
 0x30c   : > { %v502_v60 = vsub.f32 %v497_v57, %v501_v59 }
 0x30e   : > { %v503_v61 = vmul.f32 1.442695, %v502_v60 }
 0x310   : > { %668 = vpow2.f32 %v503_v61 }
 0x31a   : > { %v669_v62 = vpop.eup %668 }
 0x31b   : > { %505 = vadd.xlane.f32.xlu0 %v669_v62 }
 0x3a8   : > { %v506_v63 = vpop.xlane.xlu0 %505 }
 0x3a9   : > { %670 = vrcp.f32 %v506_v63 }
 0x3b3   : > { %v671_v0 = vpop.eup %670 }
 0x3b4   : > { %v508_v1 = vmul.f32 %v671_v0, %v669_v62 }
 0x3b6   : > { %510 = vst.msk [vmem:[%s273_s21] sm:$0xff] %vm509_vm3, %v508_v1 }
 0x3b7 PF: > { %s17_s24 = sadd.s32 1, %s678_s24  }
 0x3b8   : > { %p14_p4 = scmp.ge.s32.totalorder %s17_s24, 4  }
 0x3ba   :  { %16 = sbr.rel (!%p14_p4) target bundleno = 1 (0x1), region = 78 }

</bundles_post_ra>
